<compile_context>
chip_gen: v7x
topology: tpu7x:2x2x1
jax: 0.10.0
libtpu: 0.0.40
codegen_flags: <defaults>
</compile_context>

<pallas_src>
import functools

import jax
import jax.numpy as jnp
from jax.experimental import pallas as pl
from jax.experimental.pallas import tpu as pltpu


def _round_up(n, m):
    return ((n + m - 1) // m) * m


def _hyperplane_proj_kernel(rel_ref, wtab_ref, x_ref, *out_refs,
                            use_onehot, return_w_r):
    """One batch tile: gather w_r rows in-kernel, then project x off w_r.

    rel_ref:   [tb, 1]  int32 relation ids for this tile (VMEM)
    wtab_ref:  [R, D]   full embedding table (VMEM resident, block never moves)
    x_ref:     [tb, D]  entity embedding tile
    out_refs:  (x_proj [tb, D][, w_r [tb, D]])
    """
    xproj_ref = out_refs[0]
    tb, D = x_ref.shape
    R = wtab_ref.shape[0]

    rel = rel_ref[...]                        # [tb, 1] int32
    x = x_ref[...].astype(jnp.float32)        # [tb, D] f32 accumulation

    if use_onehot:
        # Large-R fallback: one-hot selection on the MXU.  HIGHEST keeps the
        # f32 x f32 matmul at full precision so the 0/1 selection is exact.
        col = jax.lax.broadcasted_iota(jnp.int32, (tb, R), 1)
        onehot = (rel == col).astype(jnp.float32)
        w_r = jnp.dot(onehot, wtab_ref[...].astype(jnp.float32),
                      preferred_element_type=jnp.float32,
                      precision=jax.lax.Precision.HIGHEST)
    else:
        # Small-R path: unrolled, bit-exact VPU select-accumulate.  Note that
        # (like the one-hot path, unlike nn.Embedding) out-of-range relation
        # ids yield an all-zero w_r row instead of raising.
        w_r = jnp.zeros((tb, D), jnp.float32)
        for r in range(R):
            row = wtab_ref[pl.ds(r, 1), :].astype(jnp.float32)   # [1, D]
            w_r = jnp.where(rel == r, row, w_r)

    dot = jnp.sum(w_r * x, axis=-1, keepdims=True)               # [tb, 1]
    xproj_ref[...] = (x - dot * w_r).astype(xproj_ref.dtype)
    if return_w_r:
        out_refs[1][...] = w_r.astype(out_refs[1].dtype)


def _choose_tb(B, D, R, x_itemsize, tab_itemsize, sublane, *,
               budget_bytes=6 << 20, tb_cap=2048, return_w_r=True,
               min_grid_steps=8):
    # Double-buffered pipelined blocks per batch row:
    #   x in + x_proj out (+ w_r out) + relation ids (lane-padded to 128).
    n_big = 3 if return_w_r else 2
    per_row = 2 * (n_big * D * x_itemsize + 128 * 4)
    # In-kernel f32 temporaries (x, w_r, x - dot*w_r), single-buffered.
    per_row += 3 * D * 4
    # Resident table (double-buffered by the pipeline even though its block
    # index never changes).
    fixed = 2 * R * D * tab_itemsize
    avail = max(budget_bytes - fixed, per_row * sublane)
    tb = avail // per_row
    # Keep >= ~min_grid_steps grid steps when the batch allows so the DMA
    # pipeline reaches steady state and v7x's two TensorCores both get work
    # from dimension_semantics=("parallel",).
    tb = min(tb, tb_cap,
             max(sublane, _round_up(pl.cdiv(B, min_grid_steps), sublane)))
    return max(sublane, (tb // sublane) * sublane)


def hyperplane_projection(x, relation, w_table, *, tb=None, return_w_r=True,
                          vmem_limit_bytes=32 * 1024 * 1024,
                          select_gather_max_r=64):
    """Pallas implementation of HyperplaneProjectionLayer.forward.

    Args:
      x:        [B, D] float array (entity embeddings).
      relation: [B] integer relation indices.
      w_table:  [num_relation, D] hyperplane-normal embedding table.
      tb:       optional batch tile override (rounded to a sublane multiple).
      return_w_r: also materialize the gathered w_r rows (matches the PyTorch
        module, which returns (x - y, w_r)).  False drops one of the three
        B*D HBM streams of this bandwidth-bound op (~1.5x faster).

    Returns:
      (x_proj, w_r) if return_w_r else x_proj.
    """
    B, D = x.shape
    R = w_table.shape[0]
    relation = relation.astype(jnp.int32)

    x_itemsize = jnp.dtype(x.dtype).itemsize
    tab_itemsize = jnp.dtype(w_table.dtype).itemsize
    sublane = {4: 8, 2: 16, 1: 32}.get(x_itemsize, 8)

    # TODO(synk): for very large tables (R*D of several MiB or more) switch to
    # a scalar-prefetch / DMA row gather instead of keeping the whole table
    # resident in VMEM.
    use_onehot = R > select_gather_max_r

    if tb is None:
        tb = _choose_tb(B, D, R, x_itemsize, tab_itemsize, sublane,
                        return_w_r=return_w_r)
    tb = min(tb, _round_up(B, sublane))
    tb = max(sublane, (tb // sublane) * sublane)

    # Pad the batch to a multiple of tb; relation id 0 on padded rows selects a
    # valid table row and the rows are sliced off below.
    B_pad = _round_up(B, tb)
    if B_pad != B:
        x = jnp.pad(x, ((0, B_pad - B), (0, 0)))
        relation = jnp.pad(relation, (0, B_pad - B))
    rel2d = relation.reshape(B_pad, 1)

    grid = (B_pad // tb,)

    out_shape = [jax.ShapeDtypeStruct((B_pad, D), x.dtype)]
    out_specs = [pl.BlockSpec((tb, D), lambda i: (i, 0))]
    if return_w_r:
        out_shape.append(jax.ShapeDtypeStruct((B_pad, D), w_table.dtype))
        out_specs.append(pl.BlockSpec((tb, D), lambda i: (i, 0)))

    n_streams = 3 if return_w_r else 2
    cost = pl.CostEstimate(
        flops=4 * B_pad * D,
        transcendentals=0,
        bytes_accessed=(n_streams * B_pad * D * x_itemsize
                        + B_pad * 4 + R * D * tab_itemsize),
    )

    kernel = functools.partial(_hyperplane_proj_kernel,
                               use_onehot=use_onehot, return_w_r=return_w_r)

    outs = pl.pallas_call(
        kernel,
        out_shape=tuple(out_shape),
        grid=grid,
        in_specs=[
            pl.BlockSpec((tb, 1), lambda i: (i, 0)),   # relation ids
            pl.BlockSpec((R, D), lambda i: (0, 0)),    # resident table
            pl.BlockSpec((tb, D), lambda i: (i, 0)),   # x
        ],
        out_specs=tuple(out_specs),
        compiler_params=pltpu.CompilerParams(
            dimension_semantics=("parallel",),
            vmem_limit_bytes=vmem_limit_bytes,
        ),
        cost_estimate=cost,
    )(rel2d, w_table, x)

    if return_w_r:
        x_proj, w_r = outs
        return x_proj[:B], w_r[:B]
    x_proj = outs[0] if isinstance(outs, (tuple, list)) else outs
    return x_proj[:B]


def _reference(x, relation, w_table):
    w_r = jnp.take(w_table, relation, axis=0)
    y = jnp.sum(w_r * x, axis=-1, keepdims=True) * w_r
    return x - y, w_r


if __name__ == "__main__":
    # Small deterministic example consistent with the module:
    #   num_relation = 8, output_dim D = 256, batch B = 16.
    num_relation, D, B = 8, 256, 16

    key = jax.random.PRNGKey(0)
    k_w, k_x, k_r = jax.random.split(key, 3)

    # nn.Embedding default init ~ N(0, 1).
    w_table = jax.random.normal(k_w, (num_relation, D), dtype=jnp.float32)
    x = jax.random.normal(k_x, (B, D), dtype=jnp.float32)
    relation = jax.random.randint(k_r, (B,), 0, num_relation, dtype=jnp.int32)

    x_proj, w_r = hyperplane_projection(x, relation, w_table)
    jax.block_until_ready((x_proj, w_r))
    x_proj_ref, w_r_ref = _reference(x, relation, w_table)
    assert jnp.allclose(w_r, w_r_ref, atol=1e-6, rtol=1e-6)
    assert jnp.allclose(x_proj, x_proj_ref, atol=1e-4, rtol=1e-4)

    # Optional-output path (drops the w_r HBM stream).
    x_proj_only = hyperplane_projection(x, relation, w_table, return_w_r=False)
    jax.block_until_ready(x_proj_only)
    assert jnp.allclose(x_proj_only, x_proj_ref, atol=1e-4, rtol=1e-4)

    # Ragged batch + multi-step grid (exercises padding + pipelining).
    B2 = 200
    k_x2, k_r2 = jax.random.split(k_x)
    x2 = jax.random.normal(k_x2, (B2, D), dtype=jnp.float32)
    rel2 = jax.random.randint(k_r2, (B2,), 0, num_relation, dtype=jnp.int32)
    x_proj2, w_r2 = hyperplane_projection(x2, rel2, w_table, tb=64)
    jax.block_until_ready((x_proj2, w_r2))
    x_proj2_ref, w_r2_ref = _reference(x2, rel2, w_table)
    assert jnp.allclose(w_r2, w_r2_ref, atol=1e-6, rtol=1e-6)
    assert jnp.allclose(x_proj2, x_proj2_ref, atol=1e-4, rtol=1e-4)

    print("KERNEL_OK")
</pallas_src>

<mosaic_0001>
module attributes {stable_mosaic.version = 11 : i64} {
  func.func @_hyperplane_proj_kernel(%arg0: i32, %arg1: memref<8x1xi32, #tpu.memory_space<vmem>>, %arg2: memref<8x256xf32, #tpu.memory_space<vmem>>, %arg3: memref<8x256xf32, #tpu.memory_space<vmem>>, %arg4: memref<8x256xf32, #tpu.memory_space<vmem>>, %arg5: memref<8x256xf32, #tpu.memory_space<vmem>>) attributes {dimension_semantics = [#tpu.dimension_semantics<parallel>], iteration_bounds = array<i64: 2>, scalar_prefetch = 0 : i64, scratch_operands = 0 : i64, tpu.core_type = #tpu.core_type<tc>, window_params = [{transform_indices = @transform_0, window_bounds = array<i64: 8, 1>}, {pipeline_mode = #tpu.pipeline_mode<synchronous>, transform_indices = @transform_1, window_bounds = array<i64: 8, 256>}, {transform_indices = @transform_2, window_bounds = array<i64: 8, 256>}, {transform_indices = @transform_3, window_bounds = array<i64: 8, 256>}, {transform_indices = @transform_4, window_bounds = array<i64: 8, 256>}]} {
    %c0 = arith.constant 0 : index
    %c0_0 = arith.constant 0 : index
    %0 = vector.load %arg1[%c0, %c0_0] : memref<8x1xi32, #tpu.memory_space<vmem>>, vector<8x1xi32>
    %c0_1 = arith.constant 0 : index
    %c0_2 = arith.constant 0 : index
    %1 = vector.load %arg3[%c0_1, %c0_2] : memref<8x256xf32, #tpu.memory_space<vmem>>, vector<8x256xf32>
    %cst = arith.constant 0.000000e+00 : f32
    %2 = vector.broadcast %cst : f32 to vector<8x256xf32>
    %c0_3 = arith.constant 0 : index
    %c0_4 = arith.constant 0 : index
    %3 = vector.load %arg2[%c0_3, %c0_4] : memref<8x256xf32, #tpu.memory_space<vmem>>, vector<1x256xf32>
    %c0_i32 = arith.constant 0 : i32
    %4 = vector.broadcast %c0_i32 : i32 to vector<8x1xi32>
    %5 = arith.cmpi eq, %0, %4 : vector<8x1xi32>
    %6 = vector.shape_cast %5 : vector<8x1xi1> to vector<8x1xi1>
    %7 = vector.broadcast %6 : vector<8x1xi1> to vector<8x256xi1>
    %8 = vector.shape_cast %3 : vector<1x256xf32> to vector<1x256xf32>
    %9 = vector.broadcast %8 : vector<1x256xf32> to vector<8x256xf32>
    %10 = arith.select %7, %9, %2 : vector<8x256xi1>, vector<8x256xf32>
    %c1 = arith.constant 1 : index
    %c0_5 = arith.constant 0 : index
    %11 = vector.load %arg2[%c1, %c0_5] : memref<8x256xf32, #tpu.memory_space<vmem>>, vector<1x256xf32>
    %c1_i32 = arith.constant 1 : i32
    %12 = vector.broadcast %c1_i32 : i32 to vector<8x1xi32>
    %13 = arith.cmpi eq, %0, %12 : vector<8x1xi32>
    %14 = vector.shape_cast %13 : vector<8x1xi1> to vector<8x1xi1>
    %15 = vector.broadcast %14 : vector<8x1xi1> to vector<8x256xi1>
    %16 = vector.shape_cast %11 : vector<1x256xf32> to vector<1x256xf32>
    %17 = vector.broadcast %16 : vector<1x256xf32> to vector<8x256xf32>
    %18 = arith.select %15, %17, %10 : vector<8x256xi1>, vector<8x256xf32>
    %c2 = arith.constant 2 : index
    %c0_6 = arith.constant 0 : index
    %19 = vector.load %arg2[%c2, %c0_6] : memref<8x256xf32, #tpu.memory_space<vmem>>, vector<1x256xf32>
    %c2_i32 = arith.constant 2 : i32
    %20 = vector.broadcast %c2_i32 : i32 to vector<8x1xi32>
    %21 = arith.cmpi eq, %0, %20 : vector<8x1xi32>
    %22 = vector.shape_cast %21 : vector<8x1xi1> to vector<8x1xi1>
    %23 = vector.broadcast %22 : vector<8x1xi1> to vector<8x256xi1>
    %24 = vector.shape_cast %19 : vector<1x256xf32> to vector<1x256xf32>
    %25 = vector.broadcast %24 : vector<1x256xf32> to vector<8x256xf32>
    %26 = arith.select %23, %25, %18 : vector<8x256xi1>, vector<8x256xf32>
    %c3 = arith.constant 3 : index
    %c0_7 = arith.constant 0 : index
    %27 = vector.load %arg2[%c3, %c0_7] : memref<8x256xf32, #tpu.memory_space<vmem>>, vector<1x256xf32>
    %c3_i32 = arith.constant 3 : i32
    %28 = vector.broadcast %c3_i32 : i32 to vector<8x1xi32>
    %29 = arith.cmpi eq, %0, %28 : vector<8x1xi32>
    %30 = vector.shape_cast %29 : vector<8x1xi1> to vector<8x1xi1>
    %31 = vector.broadcast %30 : vector<8x1xi1> to vector<8x256xi1>
    %32 = vector.shape_cast %27 : vector<1x256xf32> to vector<1x256xf32>
    %33 = vector.broadcast %32 : vector<1x256xf32> to vector<8x256xf32>
    %34 = arith.select %31, %33, %26 : vector<8x256xi1>, vector<8x256xf32>
    %c4 = arith.constant 4 : index
    %c0_8 = arith.constant 0 : index
    %35 = vector.load %arg2[%c4, %c0_8] : memref<8x256xf32, #tpu.memory_space<vmem>>, vector<1x256xf32>
    %c4_i32 = arith.constant 4 : i32
    %36 = vector.broadcast %c4_i32 : i32 to vector<8x1xi32>
    %37 = arith.cmpi eq, %0, %36 : vector<8x1xi32>
    %38 = vector.shape_cast %37 : vector<8x1xi1> to vector<8x1xi1>
    %39 = vector.broadcast %38 : vector<8x1xi1> to vector<8x256xi1>
    %40 = vector.shape_cast %35 : vector<1x256xf32> to vector<1x256xf32>
    %41 = vector.broadcast %40 : vector<1x256xf32> to vector<8x256xf32>
    %42 = arith.select %39, %41, %34 : vector<8x256xi1>, vector<8x256xf32>
    %c5 = arith.constant 5 : index
    %c0_9 = arith.constant 0 : index
    %43 = vector.load %arg2[%c5, %c0_9] : memref<8x256xf32, #tpu.memory_space<vmem>>, vector<1x256xf32>
    %c5_i32 = arith.constant 5 : i32
    %44 = vector.broadcast %c5_i32 : i32 to vector<8x1xi32>
    %45 = arith.cmpi eq, %0, %44 : vector<8x1xi32>
    %46 = vector.shape_cast %45 : vector<8x1xi1> to vector<8x1xi1>
    %47 = vector.broadcast %46 : vector<8x1xi1> to vector<8x256xi1>
    %48 = vector.shape_cast %43 : vector<1x256xf32> to vector<1x256xf32>
    %49 = vector.broadcast %48 : vector<1x256xf32> to vector<8x256xf32>
    %50 = arith.select %47, %49, %42 : vector<8x256xi1>, vector<8x256xf32>
    %c6 = arith.constant 6 : index
    %c0_10 = arith.constant 0 : index
    %51 = vector.load %arg2[%c6, %c0_10] : memref<8x256xf32, #tpu.memory_space<vmem>>, vector<1x256xf32>
    %c6_i32 = arith.constant 6 : i32
    %52 = vector.broadcast %c6_i32 : i32 to vector<8x1xi32>
    %53 = arith.cmpi eq, %0, %52 : vector<8x1xi32>
    %54 = vector.shape_cast %53 : vector<8x1xi1> to vector<8x1xi1>
    %55 = vector.broadcast %54 : vector<8x1xi1> to vector<8x256xi1>
    %56 = vector.shape_cast %51 : vector<1x256xf32> to vector<1x256xf32>
    %57 = vector.broadcast %56 : vector<1x256xf32> to vector<8x256xf32>
    %58 = arith.select %55, %57, %50 : vector<8x256xi1>, vector<8x256xf32>
    %c7 = arith.constant 7 : index
    %c0_11 = arith.constant 0 : index
    %59 = vector.load %arg2[%c7, %c0_11] : memref<8x256xf32, #tpu.memory_space<vmem>>, vector<1x256xf32>
    %c7_i32 = arith.constant 7 : i32
    %60 = vector.broadcast %c7_i32 : i32 to vector<8x1xi32>
    %61 = arith.cmpi eq, %0, %60 : vector<8x1xi32>
    %62 = vector.shape_cast %61 : vector<8x1xi1> to vector<8x1xi1>
    %63 = vector.broadcast %62 : vector<8x1xi1> to vector<8x256xi1>
    %64 = vector.shape_cast %59 : vector<1x256xf32> to vector<1x256xf32>
    %65 = vector.broadcast %64 : vector<1x256xf32> to vector<8x256xf32>
    %66 = arith.select %63, %65, %58 : vector<8x256xi1>, vector<8x256xf32>
    %67 = arith.mulf %66, %1 : vector<8x256xf32>
    %cst_12 = arith.constant dense<0.000000e+00> : vector<8xf32>
    %68 = vector.multi_reduction <add>, %67, %cst_12 [1] : vector<8x256xf32> to vector<8xf32>
    %69 = vector.shape_cast %68 : vector<8xf32> to vector<8x1xf32>
    %70 = vector.broadcast %69 : vector<8x1xf32> to vector<8x256xf32>
    %71 = arith.mulf %70, %66 : vector<8x256xf32>
    %72 = arith.subf %1, %71 : vector<8x256xf32>
    %c0_13 = arith.constant 0 : index
    %c0_14 = arith.constant 0 : index
    %73 = vector.load %arg4[%c0_13, %c0_14] : memref<8x256xf32, #tpu.memory_space<vmem>>, vector<8x256xf32>
    tpu.vector_store %arg4[%c0_13, %c0_14], %72 {strides = array<i32>} : memref<8x256xf32, #tpu.memory_space<vmem>>, vector<8x256xf32>,
    %c0_15 = arith.constant 0 : index
    %c0_16 = arith.constant 0 : index
    %74 = vector.load %arg5[%c0_15, %c0_16] : memref<8x256xf32, #tpu.memory_space<vmem>>, vector<8x256xf32>
    tpu.vector_store %arg5[%c0_15, %c0_16], %66 {strides = array<i32>} : memref<8x256xf32, #tpu.memory_space<vmem>>, vector<8x256xf32>,
    return
  }
  func.func @transform_0(%arg0: i32) -> (i32, i32) {
    %c0_i32 = arith.constant 0 : i32
    %c0_i32_0 = arith.constant 0 : i32
    return %arg0, %c0_i32 : i32, i32
  }
  func.func @transform_1(%arg0: i32) -> (i32, i32) {
    %c0_i32 = arith.constant 0 : i32
    %c0_i32_0 = arith.constant 0 : i32
    %c0_i32_1 = arith.constant 0 : i32
    return %c0_i32, %c0_i32_0 : i32, i32
  }
  func.func @transform_2(%arg0: i32) -> (i32, i32) {
    %c0_i32 = arith.constant 0 : i32
    %c0_i32_0 = arith.constant 0 : i32
    return %arg0, %c0_i32 : i32, i32
  }
  func.func @transform_3(%arg0: i32) -> (i32, i32) {
    %c0_i32 = arith.constant 0 : i32
    %c0_i32_0 = arith.constant 0 : i32
    return %arg0, %c0_i32 : i32, i32
  }
  func.func @transform_4(%arg0: i32) -> (i32, i32) {
    %c0_i32 = arith.constant 0 : i32
    %c0_i32_0 = arith.constant 0 : i32
    return %arg0, %c0_i32 : i32, i32
  }
}

</mosaic_0001>

<bundles_post_ra>
// kernel: tpu_custom_call.1
= control target key start
LH: loop header
LB: loop body
LE: loop exit
PB: predicated region body
PF: predicated region fallthrough
CT: control target
= control target key end

     0   :  { %10 = vsyncpa [#allocation3], 0  ;;  %s1041_s0 = inlined_call_operand.vmem [shape: s32[16,1], index: 0, kind: input, shape index: {}]   ;;  %s1042_s1 = inlined_call_operand.vmem [shape: f32[8,256], index: 1, kind: input, shape index: {}]   ;;  %s1043_s2 = inlined_call_operand.hbm [shape: f32[16,256], index: 2, kind: input, shape index: {}]   ;;  %s1044_s3 = inlined_call_operand.hbm [shape: f32[16,256], index: 3, kind: output, shape index: {0}]   ;;  %s1045_s4 = inlined_call_operand.hbm [shape: f32[16,256], index: 4, kind: output, shape index: {1}]  }
   0x1   :  { %12 = vsyncpa [#allocation3 + $0x1], 0 }
   0x2   :  { %13 = vsyncpa [#allocation4], 0 }
   0x3   :  { %15 = vsyncpa [#allocation4 + $0x1], 0 }
   0x4   :  { %16 = vsyncpa [#allocation7], 0 }
   0x5   :  { %18 = vsyncpa [#allocation7 + $0x1], 0  ;;  %s815_s15 = smov 0   ;;  %s817_s16 = smov 0  }
   0x6   :  { %s819_s17 = smov 0   ;;  %s821_s18 = smov 0  }
   0x7 LB: > { %s836_s19 = sadd.s32 4294967295, %s784_s18   ;;  %s573_s20 = sadd.s32 4294967294, %s784_s18   ;;  %s784_s18 = sphi %s821_s18, %s1060_s18   ;;  %s780_s17 = sphi %s819_s17, %s1059_s17   ;;  %s776_s16 = sphi %s817_s16, %s1058_s16   ;;  %s772_s15 = sphi %s815_s15, %s1057_s15  }
   0x8   : > { %s840_s21 = sadd.s32 1, %s784_s18   ;;  %s78_s22 = sadd.s32 1, %s780_s17 }
   0x9   : > { %s75_s23 = ssub.s32 %s784_s18, %s840_s21  ;;  %p85_p0 = scmp.ne.s32.totalorder %s780_s17, %s776_s16 }
   0xa   : > { %p76_p1 = scmp.eq.s32.totalorder %s75_s23, 0  ;;  %p86_p2 = scmp.eq.s32.totalorder %s784_s18, 0 }
   0xb   : > { %p91_p3 = scmp.ne.s32.totalorder %s776_s16, %s772_s15  ;;  %p92_p4 = scmp.eq.s32.totalorder %s836_s19, 0 }
   0xc   : > { %s852_s24 = scalar_select %p76_p1, %s780_s17, %s78_s22  }
   0xd   : > { %p854_p5 = por %p86_p2, %p85_p0  ;;  %p858_p6 = por %p92_p4, %p91_p3 }
   0xe   : > { %p115_p7 = scmp.eq.s32.totalorder %s836_s19, 1  ;;  %p121_p8 = scmp.eq.s32.totalorder %s573_s20, 1 }
   0xf   : > { %p619_p10 = scmp.lt.s32.totalorder %s784_s18, 2  ;;  %s177_s29 = sand.u32 1, %s780_s17  }
  0x10   : > { %p865_p11 = por %p115_p7, %p85_p0  ;;  %p869_p12 = por %p121_p8, %p91_p3 }
  0x11   : > { %s599_s30 = sshll.u32 %s784_s18, 8  ;;  %s576_s5 = sshll.u32 %s177_s29, 4 }
  0x12   : > { %s1049_s27 = scalar_select %p865_p11, 1, 0 }
  0x13   : > { %s1050_s28 = scalar_select %p869_p12, 1, 0 }
  0x14   : > { %s878_s8 = scalar_lea.hbm %s1043_s2, %s599_s30  ;;  %s181_s9 = scalar_lea.vmem [#allocation2], %s576_s5 }
  0x15   : > { %s189_s10 = sshll.u32 %s181_s9, 4  ;;  %p882_p13 = pnand %p619_p10, %p854_p5  ;;  %s886_s10 = int_to_ptr.vmem [resolvable:$true] %s189_s10 }
  0x16   : > { %s178_s12 = scalar_lea.sflag [#allocation3], %s177_s29  ;;  %s656_s13 = scalar_lea.hbm %s878_s8, 256 }
  0x17   : > { %p657_p2 = scmp.ne.s32.totalorder %s878_s8, %s656_s13  ;;  %p658_p3 = pneg %p882_p13 }
  0x18   : > { %s661_s22 = scalar_lea.hbm %s1043_s2, 512  ;;  %p662_p5 = scmp.lt.u32.totalorder %s878_s8, %s1043_s2 }
  0x19   : > { %p659_p4 = pnand %p658_p3, %p657_p2  ;;  %p663_p8 = scmp.lt.u32.totalorder %s661_s22, %s656_s13 }
  0x1a   : > { %p665_p9 = scmp.lt.u32.totalorder %s656_s13, %s878_s8 }
  0x1b   : > { %p660_p7 = pneg %p659_p4  ;;  %p664_p10 = por %p663_p8, %p662_p5 }
  0x1d   : > { %p666_p0 = por %p665_p9, %p664_p10 }
  0x1f   : > { %p667_p1 = pnand %p666_p0, %p660_p7 }
  0x21   : > { %670 = shalt.err (!%p667_p1)
}
  0x22   : > { %s671_s29 = scalar_lea.vmem %s886_s10, 256  ;;  %s786_s30 = smov [#allocation2]  }
  0x23   : > { %p672_p2 = scmp.ne.s32.totalorder %s886_s10, %s671_s29  ;;  %s676_s5 = sshll.u32 %s786_s30, 4  ;;  %s677_s5 = int_to_ptr.vmem [resolvable:$false] %s676_s5 }
  0x24   : > { %s678_s6 = scalar_lea.vmem %s677_s5, 512  ;;  %p679_p11 = scmp.lt.s32.totalorder %s886_s10, %s677_s5 }
  0x25   : > { %p674_p4 = pnand %p672_p2, %p658_p3  ;;  %p680_p5 = scmp.lt.s32.totalorder %s678_s6, %s671_s29 }
  0x27   : > { %p675_p12 = pneg %p674_p4  ;;  %p681_p8 = por %p680_p5, %p679_p11 }
  0x29   : > { %p682_p9 = pnand %p681_p8, %p675_p12 }
  0x2b   : > { %685 = shalt.err (!%p682_p9)
}
  0x2c   : > { %611 = dma.hbm_to_vmem [thread:$0]  (!%p882_p13), %s878_s8, 256, %s886_s10, %s178_s12  }
  0x2d   : > { %p1052_p0 = scmp.lt.s32.totalorder %s784_s18, 3  ;;  %p1053_p1 = scmp.ge.s32.totalorder %s784_s18, 1 }
  0x2f   : > { %p195_p3 = pnand %p1053_p1, %p1052_p0 }
  0x30   : > { %s920_s7 = sand.u32 (!%p195_p3), 1, %s776_s16  }
  0x31   : > { %198 = sbr.rel (%p195_p3) target bundleno = 373 (0x175), region = 32  ;;  %s923_s9 = sshll.u32 (!%p195_p3), %s920_s7, 4 }
  0x32   : > { %s201_s13 = scalar_lea.sflag (!%p195_p3), [#allocation3], %s920_s7  ;;  %s204_s11 = scalar_lea.vmem (!%p195_p3), [#allocation2], %s923_s9 }
  0x38   : > { %759 = dma.done.wait (%p858_p6), %s201_s13, 256  }
  0x39   : > { %761 = vsyncadd (%p858_p6), %s201_s13, 4294967040  ;;  %p238_p11 = scmp.lt.s32.totalorder %s836_s19, 1  ;;  %v787_v0 = vmov 0   ;;  %v253_v10 = vlaneseq  ;;  %v245_v14 = vld [vmem:[%s1042_s1] ss:$8 sm:$0x3] }
  0x3a   : > { %655 = vset.pattern.permute.xlu1 %v787_v0  ;;  %654 = vset.pattern.permute.xlu0 %v787_v0  ;;  %v584_v15 = vld [vmem:[%s1042_s1 + $0x1] ss:$8 sm:$0x3]  ;;  %v585_v18 = vld [vmem:[%s1042_s1 + $0x2] ss:$8 sm:$0x3] }
  0x3b   : > { %s239_s8 = scalar_select %p238_p11, %s836_s19, 1  ;;  %v254_v11 = vshrl.u32 %v253_v10, 7  ;;  %v586_v21 = vld [vmem:[%s1042_s1 + $0x3] ss:$8 sm:$0x3] }
  0x3c   : > { %v587_v24 = vld [vmem:[%s1042_s1 + $0x4] ss:$8 sm:$0x3]  ;;  %v588_v34 = vld [vmem:[%s1042_s1 + $0x5] ss:$8 sm:$0x3] }
  0x3d   : > { %s583_s10 = sshll.u32 %s239_s8, 3  ;;  %v255_v12 = vsub.s32 0, %v254_v11  ;;  %v259_v13 = vsub.s32 1, %v254_v11  ;;  %v589_v38 = vld [vmem:[%s1042_s1 + $0x6] ss:$8 sm:$0x3] }
  0x3e   : > { %s241_s20 = scalar_lea.vmem %s1041_s0, %s583_s10  ;;  %v590_v45 = vld [vmem:[%s1042_s1 + $0x7] ss:$8 sm:$0x3]  ;;  %s237_s23 = scalar_lea.vmem [#allocation6], %s923_s9 }
  0x3f   : > { %v242_v1 = vld [vmem:[%s241_s20] sm:$0xff]  ;;  %v256_v19 = vrot.slane %v245_v14, %v255_v12  ;;  %v260_v20 = vrot.slane %v245_v14, %v259_v13  ;;  %v277_v22 = vrot.slane %v584_v15, %v255_v12  ;;  %v281_v23 = vrot.slane %v584_v15, %v259_v13  ;;  %v244_v59 = vld [vmem:[%s204_s11 + $0x8] sm:$0xff]  ;;  %s600_s25 = sshll.u32 %s836_s19, 8  ;;  %s431_s6 = scalar_lea.sflag [#allocation7], %s920_s7 }
  0x40   : > { %vm288_vm0 = vcmp.eq.s32.totalorder %v242_v1, 2  ;;  %vm246_vm1 = vcmp.eq.s32.totalorder %v242_v1, 0  ;;  %vm309_vm2 = vcmp.eq.s32.totalorder %v242_v1, 3  ;;  %vm267_vm3 = vcmp.eq.s32.totalorder %v242_v1, 1  ;;  %v243_v58 = vld [vmem:[%s204_s11] sm:$0xff]  ;;  %s971_s5 = scalar_lea.hbm %s1045_s4, %s600_s25  ;;  %s459_s11 = sshll.u32 %s237_s23, 4  ;;  %s460_s11 = int_to_ptr.vmem [resolvable:$true] %s459_s11 }
  0x41   : > { %v289_v2 = vsel %vm288_vm0, 1, %v787_v0  ;;  %v247_v3 = vsel %vm246_vm1, 1, %v787_v0  ;;  %v310_v4 = vsel %vm309_vm2, 1, %v787_v0  ;;  %v268_v5 = vsel %vm267_vm3, 1, %v787_v0  ;;  %s686_s13 = scalar_lea.vmem %s460_s11, 256  ;;  %p1054_p12 = scmp.ne.s32.totalorder %s1049_s27, 0 }
  0x42   : > { %291 = vperm.xlu1 %655, %v289_v2   ;;  %249 = vperm.xlu0 %654, %v247_v3   ;;  %vm351_vm4 = vcmp.eq.s32.totalorder %v242_v1, 5  ;;  %vm330_vm5 = vcmp.eq.s32.totalorder %v242_v1, 4  ;;  %vm393_vm6 = vcmp.eq.s32.totalorder %v242_v1, 7  ;;  %vm372_vm7 = vcmp.eq.s32.totalorder %v242_v1, 6  ;;  %p687_p6 = scmp.ne.s32.totalorder %s460_s11, %s686_s13  ;;  %s788_s8 = smov [#allocation6]  }
  0x43   : > { %v352_v6 = vsel %vm351_vm4, 1, %v787_v0  ;;  %v331_v7 = vsel %vm330_vm5, 1, %v787_v0  ;;  %v394_v8 = vsel %vm393_vm6, 1, %v787_v0  ;;  %v373_v9 = vsel %vm372_vm7, 1, %v787_v0  ;;  %s690_s10 = sshll.u32 %s788_s8, 4  ;;  %s691_s10 = int_to_ptr.vmem [resolvable:$false] %s690_s10 }
  0x44   : > { %v298_v25 = vrot.slane %v585_v18, %v255_v12  ;;  %v302_v26 = vrot.slane %v585_v18, %v259_v13  ;;  %v319_v29 = vrot.slane %v586_v21, %v255_v12  ;;  %v323_v30 = vrot.slane %v586_v21, %v259_v13  ;;  %p688_p13 = pnand %p687_p6, %p1054_p12  ;;  %s692_s12 = scalar_lea.vmem %s691_s10, 512 }
  0x45   : > { %v340_v33 = vrot.slane %v587_v24, %v255_v12  ;;  %v344_v37 = vrot.slane %v587_v24, %v259_v13  ;;  %v361_v46 = vrot.slane %v588_v34, %v255_v12  ;;  %v365_v47 = vrot.slane %v588_v34, %v259_v13  ;;  %p693_p10 = scmp.lt.s32.totalorder %s460_s11, %s691_s10  ;;  %p694_p2 = scmp.lt.s32.totalorder %s692_s12, %s686_s13 }
  0x46   : > { %312 = vperm.xlu1 %655, %v310_v4   ;;  %270 = vperm.xlu0 %654, %v268_v5   ;;  %v382_v48 = vrot.slane %v589_v38, %v255_v12  ;;  %v386_v51 = vrot.slane %v589_v38, %v259_v13  ;;  %v403_v52 = vrot.slane %v590_v45, %v255_v12  ;;  %p689_p7 = pneg %p688_p13 }
  0x47   : > { %v407_v53 = vrot.slane %v590_v45, %v259_v13  ;;  %p695_p4 = por %p694_p2, %p693_p10 }
  0x49   : > { %p696_p5 = pnand %p695_p4, %p689_p7 }
  0x4a   : > { %354 = vperm.xlu1 %655, %v352_v6   ;;  %333 = vperm.xlu0 %654, %v331_v7  }
  0x4e   : > { %396 = vperm.xlu1 %655, %v394_v8   ;;  %375 = vperm.xlu0 %654, %v373_v9  }
  0xc1   : > { %v292_v16 = vpop.permute.xlu1 %291  ;;  %v250_v17 = vpop.permute.xlu0 %249 }
  0xc2   : > { %vm251_vm8 = vcmp.eq.s32.totalorder %v250_v17, 1  ;;  %vm293_vm10 = vcmp.eq.s32.totalorder %v292_v16, 1 }
  0xc3   : > { %v263_v31 = vsel %vm251_vm8, %v256_v19, 0.0  ;;  %v264_v32 = vsel %vm251_vm8, %v260_v20, 0.0 }
  0xc5   : > { %v313_v27 = vpop.permute.xlu1 %312  ;;  %v271_v28 = vpop.permute.xlu0 %270 }
  0xc6   : > { %vm272_vm9 = vcmp.eq.s32.totalorder %v271_v28, 1  ;;  %vm314_vm11 = vcmp.eq.s32.totalorder %v313_v27, 1 }
  0xc7   : > { %v284_v35 = vsel %vm272_vm9, %v277_v22, %v263_v31  ;;  %v285_v36 = vsel %vm272_vm9, %v281_v23, %v264_v32 }
  0xc8   : > { %v305_v39 = vsel %vm293_vm10, %v298_v25, %v284_v35  ;;  %v306_v40 = vsel %vm293_vm10, %v302_v26, %v285_v36 }
  0xc9   : > { %v355_v41 = vpop.permute.xlu1 %354  ;;  %v326_v42 = vsel %vm314_vm11, %v319_v29, %v305_v39  ;;  %v327_v43 = vsel %vm314_vm11, %v323_v30, %v306_v40  ;;  %v334_v44 = vpop.permute.xlu0 %333 }
  0xca   : > { %vm335_vm12 = vcmp.eq.s32.totalorder %v334_v44, 1  ;;  %vm356_vm13 = vcmp.eq.s32.totalorder %v355_v41, 1 }
  0xcb   : > { %v347_v49 = vsel %vm335_vm12, %v340_v33, %v326_v42  ;;  %v348_v50 = vsel %vm335_vm12, %v344_v37, %v327_v43 }
  0xcc   : > { %v368_v56 = vsel %vm356_vm13, %v361_v46, %v347_v49  ;;  %v369_v57 = vsel %vm356_vm13, %v365_v47, %v348_v50 }
  0xcd   : > { %v397_v54 = vpop.permute.xlu1 %396  ;;  %v376_v55 = vpop.permute.xlu0 %375 }
  0xce   : > { %vm398_vm14 = vcmp.eq.s32.totalorder %v397_v54, 1  ;;  %vm377_vm15 = vcmp.eq.s32.totalorder %v376_v55, 1 }
  0xcf   : > { %v389_v60 = vsel %vm377_vm15, %v382_v48, %v368_v56  ;;  %v390_v61 = vsel %vm377_vm15, %v386_v51, %v369_v57 }
  0xd0   : > { %v410_v62 = vsel %vm398_vm14, %v403_v52, %v389_v60  ;;  %v411_v63 = vsel %vm398_vm14, %v407_v53, %v390_v61 }
  0xd1   : > { %423 = vst [vmem:[%s237_s23] sm:$0xff] %v410_v62  ;;  %424 = vst [vmem:[%s237_s23 + $0x8] sm:$0xff] %v411_v63  ;;  %v412_v0 = vmul.f32 %v410_v62, %v243_v58  ;;  %v413_v1 = vmul.f32 %v411_v63, %v244_v59 }
  0xd3   : > { %v414_v2 = vadd.f32 %v413_v1, %v412_v0 }
  0xd5   : > { %415 = vadd.xlane.f32.xlu0 %v414_v2 }
  0xd6   : > { %699 = shalt.err (!%p696_p5)
}
  0xd7   : > { %s700_s14 = scalar_lea.hbm %s971_s5, 256  ;;  %s704_s22 = scalar_lea.hbm %s1045_s4, 512 }
  0xd8   : > { %p701_p8 = scmp.ne.s32.totalorder %s971_s5, %s700_s14  ;;  %p705_p1 = scmp.lt.u32.totalorder %s971_s5, %s1045_s4 }
  0xd9   : > { %p706_p3 = scmp.lt.u32.totalorder %s704_s22, %s700_s14  ;;  %p708_p6 = scmp.lt.u32.totalorder %s700_s14, %s971_s5 }
  0xda   : > { %p702_p9 = pnand %p701_p8, %p1054_p12 }
  0xdb   : > { %p707_p11 = por %p706_p3, %p705_p1 }
  0xdc   : > { %p703_p0 = pneg %p702_p9 }
  0xdd   : > { %p709_p13 = por %p708_p6, %p707_p11 }
  0xdf   : > { %p710_p7 = pnand %p709_p13, %p703_p0 }
  0xe1   : > { %713 = shalt.err (!%p710_p7)
}
  0xe2   : > { %605 = dma.vmem_to_hbm [thread:$0]  (%p1054_p12), %s460_s11, 256, %s971_s5, %s431_s6  }
  0xe3   : > { %s230_s30 = scalar_lea.vmem [#allocation5], %s923_s9  ;;  %s997_s12 = scalar_lea.hbm %s1044_s3, %s600_s25 }
  0xe4   : > { %s445_s13 = sshll.u32 %s230_s30, 4  ;;  %s426_s5 = scalar_lea.sflag [#allocation4], %s920_s7  ;;  %s999_s13 = int_to_ptr.vmem [resolvable:$true] %s445_s13 }
  0xe5   : > { %s714_s9 = scalar_lea.vmem %s999_s13, 256  ;;  %s789_s11 = smov [#allocation5]  }
  0xe6   : > { %p715_p10 = scmp.ne.s32.totalorder %s999_s13, %s714_s9  ;;  %s718_s19 = sshll.u32 %s789_s11, 4  ;;  %s719_s19 = int_to_ptr.vmem [resolvable:$false] %s718_s19 }
  0xe7   : > { %s720_s6 = scalar_lea.vmem %s719_s19, 512  ;;  %p721_p5 = scmp.lt.s32.totalorder %s999_s13, %s719_s19 }
  0xe8   : > { %p716_p2 = pnand %p715_p10, %p1054_p12  ;;  %p722_p8 = scmp.lt.s32.totalorder %s720_s6, %s714_s9 }
  0xea   : > { %p717_p4 = pneg %p716_p2  ;;  %p723_p9 = por %p722_p8, %p721_p5 }
  0xec   : > { %p724_p0 = pnand %p723_p9, %p717_p4 }
 0x162   : > { %v416_v3 = vpop.xlane.xlu0 %415 }
 0x163   : > { %v417_v4 = vmul.f32 %v416_v3, %v410_v62  ;;  %v418_v5 = vmul.f32 %v416_v3, %v411_v63 }
 0x165   : > { %v419_v6 = vsub.f32 %v243_v58, %v417_v4  ;;  %v420_v7 = vsub.f32 %v244_v59, %v418_v5 }
 0x167   : > { %421 = vst [vmem:[%s230_s30] sm:$0xff] %v419_v6  ;;  %422 = vst [vmem:[%s230_s30 + $0x8] sm:$0xff] %v420_v7 }
 0x168   : > { %727 = shalt.err (!%p724_p0)
}
 0x169   : > { %s728_s7 = scalar_lea.hbm %s997_s12, 256  ;;  %s732_s20 = scalar_lea.hbm %s1044_s3, 512 }
 0x16a   : > { %p729_p1 = scmp.ne.s32.totalorder %s997_s12, %s728_s7  ;;  %p733_p6 = scmp.lt.u32.totalorder %s997_s12, %s1044_s3 }
 0x16b   : > { %p734_p13 = scmp.lt.u32.totalorder %s732_s20, %s728_s7  ;;  %p736_p10 = scmp.lt.u32.totalorder %s728_s7, %s997_s12 }
 0x16c   : > { %p730_p3 = pnand %p729_p1, %p1054_p12 }
 0x16d   : > { %p735_p7 = por %p734_p13, %p733_p6 }
 0x16e   : > { %p731_p11 = pneg %p730_p3 }
 0x16f   : > { %p737_p2 = por %p736_p10, %p735_p7 }
 0x171   : > { %p738_p4 = pnand %p737_p2, %p731_p11 }
 0x173   : > { %741 = shalt.err (!%p738_p4)
}
 0x174   : > { %604 = dma.vmem_to_hbm [thread:$0]  (%p1054_p12), %s999_s13, 256, %s997_s12, %s426_s5  }
 0x175 PF: > { %s471_s23 = sand.u32 1, %s772_s15   ;;  %p1055_p5 = scmp.ne.s32.totalorder %s1050_s28, 0 }
 0x176   : > { %p1056_p8 = scmp.ge.s32.totalorder %s784_s18, 2  ;;  %s472_s29 = scalar_lea.sflag [#allocation4], %s471_s23 }
 0x178   : > { %p613_p9 = pnand %p1056_p8, %p1055_p5 }
 0x17a   : > { %763 = dma.done.wait (!%p613_p9), %s472_s29, 256  }
 0x17b   : > { %765 = vsyncadd (!%p613_p9), %s472_s29, 4294967040  ;;  %s481_s30 = scalar_lea.sflag [#allocation7], %s471_s23 }
 0x17c   : > { %767 = dma.done.wait (!%p613_p9), %s481_s30, 256  }
 0x17d   : > { %769 = vsyncadd (!%p613_p9), %s481_s30, 4294967040  ;;  %p21_p12 = scmp.ge.s32.totalorder %s840_s21, 4   ;;  %s1057_s15 = smov %s776_s16 }
 0x17e   : > { %s1058_s16 = smov %s780_s17  ;;  %s1059_s17 = smov %s852_s24 }
 0x17f   : > { %s1060_s18 = smov %s840_s21  ;;  %23 = sbr.rel (!%p21_p12) target bundleno = 7 (0x7), region = 104 }
 0x186   :  { %486 = vsyncpa [#allocation3], 1 }
 0x187   :  { %488 = vsyncpa [#allocation3 + $0x1], 1 }
 0x188   :  { %489 = vsyncpa [#allocation4], 1 }
 0x189   :  { %491 = vsyncpa [#allocation4 + $0x1], 1 }
 0x18a   :  { %492 = vsyncpa [#allocation7], 1 }
 0x18b   :  { %494 = vsyncpa [#allocation7 + $0x1], 1 }

</bundles_post_ra>
